<compile_context>
chip_gen: v7x
topology: tpu7x:2x2x1
jax: 0.10.0
libtpu: 0.0.40
codegen_flags: <defaults>
</compile_context>

<pallas_src>
import functools
from typing import NamedTuple

import jax
import jax.numpy as jnp
from jax.experimental import pallas as pl
from jax.experimental.pallas import tpu as pltpu

INV_GAUSS_VAR = 0.54

_LANES = 128                      # vreg lane width (last dim)
_SUBLANES = 8                     # vreg sublane width (second-to-last dim)
_MAX_TK = 32768                   # cap on K tile (lanes)
_MAX_BT = 256                     # cap on B tile (sublanes)
_VMEM_BUDGET = 12 * 1024 * 1024   # double-buffered working-set budget (v5e-safe)
_TARGET_STEP_BYTES = 2 * 1024 * 1024


def _round_up(n, m):
    return ((n + m - 1) // m) * m


def _choose_tk(k, *, b_hint=8, out_bytes=4):
    """Lane-dense K tile: amortize ~0.35us/step overhead, stay inside VMEM."""
    per_col = 3 * 4 + b_hint * out_bytes            # mu_packed + out bytes per K column
    tk_budget = _VMEM_BUDGET // (2 * per_col)       # double-buffered cap
    tk_target = max(_TARGET_STEP_BYTES // per_col, _LANES)
    tk = max(_LANES, min(tk_budget, tk_target, _MAX_TK))
    tk = (tk // _LANES) * _LANES
    k_pad_min = _round_up(k, _LANES)
    if tk >= k_pad_min:
        # Whole problem fits one tile: keep >= 2 K tiles when possible so the
        # "parallel" K axis can split across both v7x TensorCores.
        tk = _round_up(k_pad_min // 2, _LANES) if k_pad_min >= 2 * _LANES else k_pad_min
    return tk


def _choose_b_tile(b, tk, out_bytes):
    """Sublane-dense B tile whose double-buffered footprint fits the budget."""
    b_pad = _round_up(max(b, 1), _SUBLANES)
    cap_rows = max(_SUBLANES, (_VMEM_BUDGET // (2 * tk) - 3 * 4) // out_bytes)
    bt = min(b_pad, _MAX_BT, (cap_rows // _SUBLANES) * _SUBLANES)
    bt = max(_SUBLANES, (bt // _SUBLANES) * _SUBLANES)
    return bt, _round_up(b_pad, bt)


class GMMParams(NamedTuple):
    mu_packed: jax.Array   # f32[3, K_pad] rows = [mu_x, mu_y, -0.5*quad(mu)]
    cov_folded: jax.Array  # f32[3] = -0.5 * [cov00, cov01+cov10, cov11]
    k: int                 # true number of mixture components
    tk: int                # K tile (multiple of 128)
    c: float               # scalar multiplier (1.0 in the module)


def prepare_gmm(mu, cov=None, c=1.0, *, tk=None, b_hint=8):
    """One-time model setup (mirrors GMMAgent.__init__): layout + algebraic prefold."""
    mu = jnp.asarray(mu, jnp.float32)
    k = int(mu.shape[0])
    if cov is None:
        cov = INV_GAUSS_VAR * jnp.eye(2, dtype=jnp.float32)
    cov = jnp.asarray(cov, jnp.float32)

    # Fold the -0.5 of the Gaussian exponent into the (symmetrized) cov terms.
    a = -0.5 * cov[0, 0]
    b = -0.5 * (cov[0, 1] + cov[1, 0])
    d = -0.5 * cov[1, 1]
    cov_folded = jnp.stack([a, b, d])

    if tk is None:
        tk = _choose_tk(k, b_hint=b_hint)
    assert tk % _LANES == 0
    k_pad = _round_up(k, tk)

    m0 = mu[:, 0]
    m1 = mu[:, 1]
    t = a * m0 * m0 + b * m0 * m1 + d * m1 * m1       # mu-only quadratic term
    packed = jnp.stack([m0, m1, t], axis=0)           # (3, K)
    packed = jnp.pad(packed, ((0, 0), (0, k_pad - k)))  # zero pad: finite, stripped later
    return GMMParams(packed, cov_folded, k, int(tk), float(c))


def _gmm_pdf_kernel(coef_ref, mu_ref, o_ref, *, c):
    """exp(s + u*m0 + v*m1 + t) for one (b_tile, tk) output tile.

    coef_ref: VMEM f32[b_tile, 3]   per-agent [s, u, v] (resident across K tiles)
    mu_ref:   VMEM f32[3, tk]       rows [m0, m1, t]
    o_ref:    VMEM   [b_tile, tk]   f32 or bf16
    """
    s = coef_ref[:, 0:1]            # (b_tile, 1)
    u = coef_ref[:, 1:2]
    v = coef_ref[:, 2:3]
    m0 = mu_ref[0:1, :]             # (1, tk)
    m1 = mu_ref[1:2, :]
    t = mu_ref[2:3, :]
    # 2 muls + 3 adds per element on the VPU; exp goes to the EUP slot.
    q = (u * m0 + v * m1) + (s + t)
    r = jnp.exp(q)
    if c != 1.0:                    # trace-time Python float; skipped for c == 1
        r = r * c
    o_ref[...] = r.astype(o_ref.dtype)


def gmm_pdf_batched(xs, params: GMMParams, *, out_dtype=jnp.float32):
    """Batched Gaussian PDF: xs (B, 2) agent points -> (B, K)."""
    xs = jnp.asarray(xs, jnp.float32)
    bsz = int(xs.shape[0])
    k_pad = params.mu_packed.shape[1]
    tk = params.tk
    assert k_pad % tk == 0 and tk % _LANES == 0
    out_bytes = jnp.dtype(out_dtype).itemsize
    b_tile, b_pad = _choose_b_tile(bsz, tk, out_bytes)

    # Per-agent scalar coefficients of the expanded quadratic (tiny fused XLA op).
    a = params.cov_folded[0]
    b = params.cov_folded[1]
    d = params.cov_folded[2]
    x0 = xs[:, 0]
    x1 = xs[:, 1]
    s = a * x0 * x0 + b * x0 * x1 + d * x1 * x1
    u = -(2.0 * a * x0 + b * x1)
    v = -(2.0 * d * x1 + b * x0)
    coefs = jnp.stack([s, u, v], axis=1)                 # (B, 3)
    coefs = jnp.pad(coefs, ((0, b_pad - bsz), (0, 0)))   # sublane-dense B

    grid = (b_pad // b_tile, k_pad // tk)
    out = pl.pallas_call(
        functools.partial(_gmm_pdf_kernel, c=params.c),
        out_shape=jax.ShapeDtypeStruct((b_pad, k_pad), out_dtype),
        grid=grid,
        in_specs=[
            pl.BlockSpec((b_tile, 3), lambda i, j: (i, 0)),   # agent coefs (resident over K)
            pl.BlockSpec((3, tk), lambda i, j: (0, j)),       # mu tile (streams over K)
        ],
        out_specs=pl.BlockSpec((b_tile, tk), lambda i, j: (i, j)),
        compiler_params=pltpu.CompilerParams(
            dimension_semantics=("parallel", "parallel")),    # both axes TC-shardable
    )(coefs, params.mu_packed)

    # Always strip B / K padding (padded columns hold finite garbage by design).
    return out[:bsz, :params.k]


def gmm_agent_forward(x, params: GMMParams, *, out_dtype=jnp.float32):
    """GMMAgent.forward(): x (2,) -> (K,)."""
    return gmm_pdf_batched(jnp.reshape(x, (1, 2)), params, out_dtype=out_dtype)[0]


if __name__ == "__main__":
    key = jax.random.PRNGKey(0)
    k_mu, k_x, k_xs, k_mu2 = jax.random.split(key, 4)

    cov = INV_GAUSS_VAR * jnp.eye(2, dtype=jnp.float32)

    # --- GMMAgent: K = 8 mixture components, single agent point x (2,) ---
    K = 8
    mu = jax.random.normal(k_mu, (K, 2), dtype=jnp.float32)
    x = 0.01 * jax.random.normal(k_x, (2,), dtype=jnp.float32)   # nn.Parameter init

    params = prepare_gmm(mu, cov, c=1.0)          # one-time construction-time work
    out = jax.block_until_ready(gmm_agent_forward(x, params))

    diff = x[None, :] - mu                                       # (K, 2)
    ref = 1.0 * jnp.exp(-0.5 * jnp.diagonal(diff @ cov @ diff.T))
    assert out.shape == (K,)
    assert jnp.allclose(out, ref, atol=1e-5, rtol=1e-5), (out, ref)

    # --- batched agents, non-multiple K (exercises B/K padding + K tiling) ---
    K2, B = 200, 4
    mu2 = jax.random.normal(k_mu2, (K2, 2), dtype=jnp.float32)
    xs = 0.01 * jax.random.normal(k_xs, (B, 2), dtype=jnp.float32)
    params2 = prepare_gmm(mu2, cov, c=1.0)
    out_b = jax.block_until_ready(gmm_pdf_batched(xs, params2))

    diffs = xs[:, None, :] - mu2[None, :, :]                     # (B, K2, 2)
    q = jnp.einsum('bki,ij,bkj->bk', diffs, cov, diffs)
    ref_b = jnp.exp(-0.5 * q)
    assert out_b.shape == (B, K2)
    assert jnp.allclose(out_b, ref_b, atol=1e-5, rtol=1e-5), (out_b, ref_b)

    print("KERNEL_OK")
</pallas_src>

<mosaic_0001>
module attributes {stable_mosaic.version = 11 : i64} {
  func.func @_gmm_pdf_kernel(%arg0: i32, %arg1: i32, %arg2: memref<8x3xf32, #tpu.memory_space<vmem>>, %arg3: memref<3x128xf32, #tpu.memory_space<vmem>>, %arg4: memref<8x128xf32, #tpu.memory_space<vmem>>) attributes {dimension_semantics = [#tpu.dimension_semantics<parallel>, #tpu.dimension_semantics<parallel>], iteration_bounds = array<i64: 1, 1>, scalar_prefetch = 0 : i64, scratch_operands = 0 : i64, tpu.core_type = #tpu.core_type<tc>, window_params = [{transform_indices = @transform_0, window_bounds = array<i64: 8, 3>}, {transform_indices = @transform_1, window_bounds = array<i64: 3, 128>}, {transform_indices = @transform_2, window_bounds = array<i64: 8, 128>}]} {
    %c0 = arith.constant 0 : index
    %c0_0 = arith.constant 0 : index
    %0 = vector.load %arg2[%c0, %c0_0] : memref<8x3xf32, #tpu.memory_space<vmem>>, vector<8x1xf32>
    %c0_1 = arith.constant 0 : index
    %c1 = arith.constant 1 : index
    %1 = vector.load %arg2[%c0_1, %c1] : memref<8x3xf32, #tpu.memory_space<vmem>>, vector<8x1xf32>
    %c0_2 = arith.constant 0 : index
    %c2 = arith.constant 2 : index
    %2 = vector.load %arg2[%c0_2, %c2] : memref<8x3xf32, #tpu.memory_space<vmem>>, vector<8x1xf32>
    %c0_3 = arith.constant 0 : index
    %c0_4 = arith.constant 0 : index
    %3 = vector.load %arg3[%c0_3, %c0_4] : memref<3x128xf32, #tpu.memory_space<vmem>>, vector<1x128xf32>
    %c1_5 = arith.constant 1 : index
    %c0_6 = arith.constant 0 : index
    %4 = vector.load %arg3[%c1_5, %c0_6] : memref<3x128xf32, #tpu.memory_space<vmem>>, vector<1x128xf32>
    %c2_7 = arith.constant 2 : index
    %c0_8 = arith.constant 0 : index
    %5 = vector.load %arg3[%c2_7, %c0_8] : memref<3x128xf32, #tpu.memory_space<vmem>>, vector<1x128xf32>
    %6 = vector.broadcast %1 : vector<8x1xf32> to vector<8x128xf32>
    %7 = vector.broadcast %3 : vector<1x128xf32> to vector<8x128xf32>
    %8 = arith.mulf %6, %7 : vector<8x128xf32>
    %9 = vector.broadcast %2 : vector<8x1xf32> to vector<8x128xf32>
    %10 = vector.broadcast %4 : vector<1x128xf32> to vector<8x128xf32>
    %11 = arith.mulf %9, %10 : vector<8x128xf32>
    %12 = arith.addf %8, %11 : vector<8x128xf32>
    %13 = vector.broadcast %0 : vector<8x1xf32> to vector<8x128xf32>
    %14 = vector.broadcast %5 : vector<1x128xf32> to vector<8x128xf32>
    %15 = arith.addf %13, %14 : vector<8x128xf32>
    %16 = arith.addf %12, %15 : vector<8x128xf32>
    %17 = math.exp %16 : vector<8x128xf32>
    %c0_9 = arith.constant 0 : index
    %c0_10 = arith.constant 0 : index
    %18 = vector.load %arg4[%c0_9, %c0_10] : memref<8x128xf32, #tpu.memory_space<vmem>>, vector<8x128xf32>
    tpu.vector_store %arg4[%c0_9, %c0_10], %17 {strides = array<i32>} : memref<8x128xf32, #tpu.memory_space<vmem>>, vector<8x128xf32>,
    return
  }
  func.func @transform_0(%arg0: i32, %arg1: i32) -> (i32, i32) {
    %c0_i32 = arith.constant 0 : i32
    %c0_i32_0 = arith.constant 0 : i32
    return %arg0, %c0_i32 : i32, i32
  }
  func.func @transform_1(%arg0: i32, %arg1: i32) -> (i32, i32) {
    %c0_i32 = arith.constant 0 : i32
    %c0_i32_0 = arith.constant 0 : i32
    return %c0_i32, %arg1 : i32, i32
  }
  func.func @transform_2(%arg0: i32, %arg1: i32) -> (i32, i32) {
    %c0_i32 = arith.constant 0 : i32
    return %arg0, %arg1 : i32, i32
  }
}

</mosaic_0001>

<bundles_post_ra>
// kernel: tpu_custom_call.1
= control target key start
LH: loop header
LB: loop body
LE: loop exit
PB: predicated region body
PF: predicated region fallthrough
CT: control target
= control target key end

     0   :  { %v100_v1 = vmov 1   ;;  %v101_v2 = vmov 0   ;;  %s143_s0 = inlined_call_operand.vmem [shape: f32[8,3], index: 0, kind: input, shape index: {}]   ;;  %s144_s1 = inlined_call_operand.vmem [shape: f32[3,128], index: 1, kind: input, shape index: {}]   ;;  %s145_s2 = inlined_call_operand.hbm [shape: f32[8,128], index: 2, kind: output, shape index: {}]  }
   0x1   :  { %v12_v0 = vld [vmem:[%s143_s0] sm:$0xff]  ;;  %70 = vset.pattern.permute.xlu0 %v100_v1  ;;  %72 = vset.pattern.permute.xlu1 %v101_v2 }
   0x2   :  { %7 = vsyncpa [#allocation3], 0  ;;  %18 = vperm.xlu0 %70, %v12_v0   ;;  %37 = vperm.xlu1 %72, %v12_v0   ;;  %v102_v3 = vmov 2   ;;  %v63_v5 = vld [vmem:[%s144_s1] ss:$0 sm:$0xff]  ;;  %s103_s16 = smov [#allocation2]  }
   0x3   :  { %v64_v6 = vld [vmem:[%s144_s1 + $0x1] ss:$0 sm:$0xff]  ;;  %v65_v7 = vld [vmem:[%s144_s1 + $0x2] ss:$0 sm:$0xff]  ;;  %s55_s17 = sshll.u32 %s103_s16, 4  ;;  %s56_s17 = int_to_ptr.vmem [resolvable:$true] %s55_s17 }
   0x4   :  { %s76_s18 = scalar_lea.vmem %s56_s17, 128  ;;  %p81_p1 = scmp.lt.s32.totalorder %s56_s17, %s56_s17 }
   0x5   :  { %p77_p0 = scmp.ne.s32.totalorder %s56_s17, %s76_s18  ;;  %p82_p2 = scmp.lt.s32.totalorder %s76_s18, %s76_s18 }
   0x6   :  { %71 = vset.pattern.permute.xlu0 %v102_v3 }
   0x7   :  { %27 = vperm.xlu0 %71, %v12_v0   ;;  %p83_p3 = por %p82_p2, %p81_p1 }
   0x9   :  { %p84_p4 = pnand %p83_p3, %p77_p0 }
   0xb   :  { %73 = vset.pattern.permute.xlu0 %v101_v2 }
  0x81   :  { %v19_v4 = vpop.permute.xlu0 %18  ;;  %v38_v8 = vpop.permute.xlu1 %37 }
  0x82   :  { %v25_v10 = vmul.f32 %v63_v5, %v19_v4  ;;  %v44_v12 = vadd.f32 %v65_v7, %v38_v8 }
  0x86   :  { %v28_v9 = vpop.permute.xlu0 %27 }
  0x87   :  { %v34_v11 = vmul.f32 %v64_v6, %v28_v9 }
  0x89   :  { %v35_v13 = vadd.f32 %v34_v11, %v25_v10 }
  0x8b   :  { %v45_v14 = vadd.f32 %v44_v12, %v35_v13 }
  0x8d   :  { %v46_v15 = vmul.f32 1.442695, %v45_v14 }
  0x8f   :  { %74 = vpow2.f32 %v46_v15 }
  0x99   :  { %v75_v16 = vpop.eup %74 }
  0x9a   :  { %48 = vst [vmem:[#allocation2] sm:$0xff] %v75_v16 }
  0x9b   :  { %87 = shalt.err (!%p84_p4)
}
  0x9c   :  { %s88_s20 = scalar_lea.hbm %s145_s2, 128 }
  0x9d   :  { %p89_p5 = scmp.ne.s32.totalorder %s145_s2, %s88_s20  ;;  %p92_p6 = scmp.lt.u32.totalorder %s88_s20, %s145_s2 }
  0x9f   :  { %p94_p7 = pnand %p92_p6, %p89_p5 }
  0xa1   :  { %97 = shalt.err (!%p94_p7)
}
  0xa2   :  { %58 = dma.vmem_to_hbm [thread:$0]  %s56_s17, 128, %s145_s2, [#allocation3]  }
  0xa3   :  { %98 = dma.done.wait [#allocation3], 128  }
  0xa4   :  { %99 = vsyncadd [#allocation3], 4294967168 }
  0xa5   :  { %62 = vsyncpa [#allocation3], 1 }

</bundles_post_ra>
